<compile_context>
chip_gen: v7x
topology: tpu7x:2x2x1
jax: 0.10.0
libtpu: 0.0.40
codegen_flags: <defaults>
</compile_context>

<pallas_src>
import jax
import jax.numpy as jnp
from jax.experimental import pallas as pl
from jax.experimental.pallas import tpu as pltpu

_MAX_CONCURRENT_DMAS = 4
_MIN_BYTES_PER_DMA = 256 * 1024  # don't bother splitting below ~256 KiB/DMA


def _chunk_bounds(leading, nbytes):
    """Static (start, size) slabs along axis 0 for concurrent HBM->HBM DMAs."""
    if leading <= 1:
        return ((0, max(leading, 1)),)
    n = min(leading, _MAX_CONCURRENT_DMAS, max(1, nbytes // _MIN_BYTES_PER_DMA))
    base, rem = divmod(leading, n)
    bounds, start = [], 0
    for i in range(n):
        size = base + (1 if i < rem else 0)
        bounds.append((start, size))
        start += size
    return tuple(bounds)


def _make_hbm_copy_kernel(bounds):
    """Identity copy: start all chunk DMAs, then wait on all of them."""

    def kernel(x_hbm, o_hbm, sems):
        copies = []
        for idx, (start, size) in enumerate(bounds):
            cp = pltpu.make_async_copy(
                x_hbm.at[pl.ds(start, size)],
                o_hbm.at[pl.ds(start, size)],
                sems.at[idx],
            )
            cp.start()
            copies.append(cp)
        for cp in copies:
            cp.wait()

    return kernel


@jax.jit
def downcast_forward(x):
    """Pallas implementation of downcast.forward (identity pass-through)."""
    if x.size == 0:
        # Nothing to copy; avoid zero-length DMAs / degenerate chunking.
        return x

    orig_shape = x.shape
    x_view = x.reshape(1) if x.ndim == 0 else x

    nbytes = x_view.size * x_view.dtype.itemsize
    bounds = _chunk_bounds(x_view.shape[0], nbytes)
    kernel = _make_hbm_copy_kernel(bounds)

    out = pl.pallas_call(
        kernel,
        out_shape=jax.ShapeDtypeStruct(x_view.shape, x_view.dtype),
        in_specs=[pl.BlockSpec(memory_space=pl.ANY)],
        out_specs=pl.BlockSpec(memory_space=pl.ANY),
        scratch_shapes=[pltpu.SemaphoreType.DMA((len(bounds),))],
        cost_estimate=pl.CostEstimate(
            flops=0, transcendentals=0, bytes_accessed=2 * nbytes
        ),
    )(x_view)

    return out.reshape(orig_shape)


if __name__ == "__main__":
    key = jax.random.PRNGKey(0)

    # Small NCHW input consistent with the conv-style test transform.
    x = jax.random.normal(key, (2, 4, 16, 16), dtype=jnp.float32)
    y = downcast_forward(x)
    jax.block_until_ready(y)
    assert y.shape == x.shape and y.dtype == x.dtype
    assert bool(jnp.all(y == x))

    # Odd / non-128-multiple shape: with the HBM->HBM DMA there is no
    # lane-masking penalty path anymore — still a plain contiguous copy.
    x_odd = jax.random.normal(jax.random.PRNGKey(1), (3, 5, 7), dtype=jnp.float32)
    y_odd = downcast_forward(x_odd)
    jax.block_until_ready(y_odd)
    assert y_odd.shape == x_odd.shape and y_odd.dtype == x_odd.dtype
    assert bool(jnp.all(y_odd == x_odd))

    # 1 MiB tensor exercises the multi-DMA (4 concurrent copies) path.
    x_big = jax.random.normal(jax.random.PRNGKey(2), (4, 128, 512), dtype=jnp.float32)
    y_big = downcast_forward(x_big)
    jax.block_until_ready(y_big)
    assert y_big.shape == x_big.shape and y_big.dtype == x_big.dtype
    assert bool(jnp.all(y_big == x_big))

    # Scalar goes through the (1,)-view path.
    x_scalar = jnp.asarray(1.25, dtype=jnp.float32)
    y_scalar = downcast_forward(x_scalar)
    jax.block_until_ready(y_scalar)
    assert y_scalar.shape == () and bool(y_scalar == x_scalar)

    print("KERNEL_OK")
</pallas_src>

<mosaic_0001>
module attributes {stable_mosaic.version = 11 : i64} {
  func.func @kernel(%arg0: memref<2x4x16x16xf32, #tpu.memory_space<any>>, %arg1: memref<2x4x16x16xf32, #tpu.memory_space<any>>, %arg2: memref<1x!tpu.dma_semaphore, #tpu.memory_space<semaphore_mem>>) attributes {dimension_semantics = [], scalar_prefetch = 0 : i64, scratch_operands = 1 : i64, tpu.core_type = #tpu.core_type<tc>} {
    %c0_i32 = arith.constant 0 : i32
    %c0_i32_0 = arith.constant 0 : i32
    %c0_i32_1 = arith.constant 0 : i32
    %c0_i32_2 = arith.constant 0 : i32
    %c0_i32_3 = arith.constant 0 : i32
    %0 = tpu.memref_slice %arg0[%c0_i32_0, %c0_i32_1, %c0_i32_2, %c0_i32_3] : memref<2x4x16x16xf32, #tpu.memory_space<any>> -> memref<2x4x16x16xf32, #tpu.memory_space<any>>
    %c0_i32_4 = arith.constant 0 : i32
    %c0_i32_5 = arith.constant 0 : i32
    %c0_i32_6 = arith.constant 0 : i32
    %c0_i32_7 = arith.constant 0 : i32
    %1 = tpu.memref_slice %arg1[%c0_i32_4, %c0_i32_5, %c0_i32_6, %c0_i32_7] : memref<2x4x16x16xf32, #tpu.memory_space<any>> -> memref<2x4x16x16xf32, #tpu.memory_space<any>>
    %2 = tpu.memref_slice %arg2[%c0_i32] : memref<1x!tpu.dma_semaphore, #tpu.memory_space<semaphore_mem>> -> memref<1x!tpu.dma_semaphore, #tpu.memory_space<semaphore_mem>>
    %3 = tpu.memref_squeeze %2 : memref<1x!tpu.dma_semaphore, #tpu.memory_space<semaphore_mem>> -> memref<!tpu.dma_semaphore, #tpu.memory_space<semaphore_mem>>
    tpu.enqueue_dma source(%0 : memref<2x4x16x16xf32, #tpu.memory_space<any>>) target(%1 : memref<2x4x16x16xf32, #tpu.memory_space<any>>) target_semaphore(%3 : memref<!tpu.dma_semaphore, #tpu.memory_space<semaphore_mem>>)
    %c0_i32_8 = arith.constant 0 : i32
    %c0_i32_9 = arith.constant 0 : i32
    %c0_i32_10 = arith.constant 0 : i32
    %c0_i32_11 = arith.constant 0 : i32
    %c0_i32_12 = arith.constant 0 : i32
    %4 = tpu.memref_slice %arg0[%c0_i32_9, %c0_i32_10, %c0_i32_11, %c0_i32_12] : memref<2x4x16x16xf32, #tpu.memory_space<any>> -> memref<2x4x16x16xf32, #tpu.memory_space<any>>
    %c0_i32_13 = arith.constant 0 : i32
    %c0_i32_14 = arith.constant 0 : i32
    %c0_i32_15 = arith.constant 0 : i32
    %c0_i32_16 = arith.constant 0 : i32
    %5 = tpu.memref_slice %arg1[%c0_i32_13, %c0_i32_14, %c0_i32_15, %c0_i32_16] : memref<2x4x16x16xf32, #tpu.memory_space<any>> -> memref<2x4x16x16xf32, #tpu.memory_space<any>>
    %6 = tpu.memref_slice %arg2[%c0_i32_8] : memref<1x!tpu.dma_semaphore, #tpu.memory_space<semaphore_mem>> -> memref<1x!tpu.dma_semaphore, #tpu.memory_space<semaphore_mem>>
    %7 = tpu.memref_squeeze %6 : memref<1x!tpu.dma_semaphore, #tpu.memory_space<semaphore_mem>> -> memref<!tpu.dma_semaphore, #tpu.memory_space<semaphore_mem>>
    tpu.wait_dma2 semaphore(%7 : memref<!tpu.dma_semaphore, #tpu.memory_space<semaphore_mem>>) src(%4 : memref<2x4x16x16xf32, #tpu.memory_space<any>>) dst(%5 : memref<2x4x16x16xf32, #tpu.memory_space<any>>)
    return
  }
}

</mosaic_0001>

<bundles_post_ra>
// kernel: downcast_forward.1
= control target key start
LH: loop header
LB: loop body
LE: loop exit
PB: predicated region body
PF: predicated region fallthrough
CT: control target
= control target key end

     0   :  { %s36_s6 = smov [#allocation2]   ;;  %s37_s7 = smov [#allocation3]   ;;  %s55_s0 = inlined_call_operand.hbm [shape: f32[2,4,16,16], index: 0, kind: input, shape index: {}]   ;;  %s56_s1 = inlined_call_operand.hbm [shape: f32[2,4,16,16], index: 1, kind: output, shape index: {}]  }
   0x1   :  { %s38_s8 = smov 0  }
   0x2   :  { %18 = dma.general %s55_s0, 2048, %s56_s1, %s36_s6, %s37_s7, [#allocation4], %s38_s8, 0  }
   0x3   :  { %34 = dma.done.wait [#allocation2], 2048 }
   0x4   :  { %35 = vsyncadd [#allocation2], 4294965248 }
   0x5   :  { %24 = vsyncmov [#allocation2] }
   0x8   :  { %s25_s13 = vpop.sfrf %24 }
   0x9   :  { %p30_p0 = scmp.ne.s32.totalorder %s25_s13, 0 }
   0xb   :  { %29 = shalt.err (%p30_p0)  }

</bundles_post_ra>
